<compile_context>
chip_gen: v5e
topology: v5e:2x2
jax: 0.10.0
libtpu: 0.0.40
codegen_flags: <defaults>
</compile_context>

<pallas_src>
import functools

import jax
import jax.numpy as jnp
from jax.experimental import pallas as pl
from jax.experimental.pallas import tpu as pltpu

_NEG_INF = -1e9
_LANE = 128


def _round_up(n, m):
    return (n + m - 1) // m * m


def _choose_block_b(bp):
    """bp is a multiple of 128. Pick the largest block in {512, 256, 128} that
    divides bp while still leaving >= 2 grid steps (so v7x's 2 TensorCores and
    the software pipeline have work)."""
    for cand in (512, 256, 128):
        if bp % cand == 0 and bp // cand >= 2:
            return cand
    return 128


def _discriminator_kernel(x_ref, w1_ref, b1_ref, w2_ref, b2_ref,
                          last_ref, logits_ref, probs_ref):
    # Hidden layer: MXU matmul (f32 accumulation) + bias + LeakyReLU(0.2).
    h = jnp.dot(x_ref[...], w1_ref[...], preferred_element_type=jnp.float32)
    h = h + b1_ref[...].astype(jnp.float32)
    h = jnp.where(h > 0, h, 0.2 * h)
    last_ref[...] = h.astype(last_ref.dtype)

    # Classifier head: lane-padded to 128 outputs; padded bias lanes are -1e9
    # so they contribute exp(-inf) ~ 0 to the softmax denominator.
    z = jnp.dot(h.astype(w2_ref.dtype), w2_ref[...],
                preferred_element_type=jnp.float32)
    z = z + b2_ref[...].astype(jnp.float32)
    logits_ref[...] = z.astype(logits_ref.dtype)

    # Numerically stable softmax; divide via EUP approximate reciprocal.
    m = jnp.max(z, axis=-1, keepdims=True)           # XLU
    e = jnp.exp(z - m)                                # EUP
    denom = jnp.sum(e, axis=-1, keepdims=True)        # XLU
    probs_ref[...] = (e * pl.reciprocal(denom, approx=True)).astype(probs_ref.dtype)


@functools.partial(jax.jit, static_argnames=("block_b", "matmul_dtype"))
def discriminator_forward(x, w1, b1, w2, b2, *, block_b=None, matmul_dtype=None):
    """Discriminator forward (eval mode: dropout = identity).

    x : [B, D]              input_rep
    w1: [D, H],  b1: [1, H] hidden nn.Linear (weights stored transposed)
    w2: [H, C],  b2: [1, C] logit head, C = num_labels + 1
    matmul_dtype: e.g. jnp.bfloat16 to run MXU operands in bf16 (v6e/v7x).
    Returns (last_rep [B, H], logits [B, C], probs [B, C]).
    """
    B, D = x.shape
    H = w1.shape[1]
    C = w2.shape[1]
    out_dtype = x.dtype

    # --- batch tiling: pad B up to a multiple of the (large) block size -------
    bp = _round_up(max(B, 1), _LANE)
    if block_b is None:
        blk = _choose_block_b(bp)
    else:
        blk = block_b
        bp = _round_up(max(B, 1), blk)
    if bp != B:
        x = jnp.pad(x, ((0, bp - B), (0, 0)))

    # --- lane-dense classifier head: pad C -> multiple of 128 -----------------
    cp = _round_up(C, _LANE)
    if cp != C:
        w2 = jnp.pad(w2, ((0, 0), (0, cp - C)))
        b2 = jnp.pad(b2, ((0, 0), (0, cp - C)), constant_values=_NEG_INF)

    # --- optional bf16 matmul operands (halves HBM traffic, 2x MXU on v6e/v7x)
    if matmul_dtype is not None:
        x = x.astype(matmul_dtype)
        w1 = w1.astype(matmul_dtype)
        w2 = w2.astype(matmul_dtype)

    grid = (bp // blk,)

    out_shapes = (
        jax.ShapeDtypeStruct((bp, H), out_dtype),     # last_rep
        jax.ShapeDtypeStruct((bp, cp), out_dtype),    # logits (lane-padded)
        jax.ShapeDtypeStruct((bp, cp), out_dtype),    # probs  (lane-padded)
    )

    grid_spec = pltpu.PrefetchScalarGridSpec(
        num_scalar_prefetch=0,
        grid=grid,
        in_specs=[
            pl.BlockSpec((blk, D), lambda i: (i, 0)),    # x tile
            pl.BlockSpec((D, H), lambda i: (0, 0)),      # W1 (resident)
            pl.BlockSpec((1, H), lambda i: (0, 0)),      # b1
            pl.BlockSpec((H, cp), lambda i: (0, 0)),     # W2 (lane-padded)
            pl.BlockSpec((1, cp), lambda i: (0, 0)),     # b2 (lane-padded)
        ],
        out_specs=[
            pl.BlockSpec((blk, H), lambda i: (i, 0)),
            pl.BlockSpec((blk, cp), lambda i: (i, 0)),
            pl.BlockSpec((blk, cp), lambda i: (i, 0)),
        ],
    )

    # TODO(synk): for production-sized layers (D/H in the multi-K range) add a
    # K-reduction grid axis ("arbitrary") with a VMEM accumulator instead of a
    # fully resident W1, and set vmem_limit_bytes explicitly (v7x has 64 MiB).
    last, logits, probs = pl.pallas_call(
        _discriminator_kernel,
        out_shape=out_shapes,
        grid_spec=grid_spec,
        compiler_params=pltpu.CompilerParams(
            dimension_semantics=("parallel",)),
    )(x, w1, b1, w2, b2)

    # Strip batch padding and classifier-head lane padding.
    return last[:B], logits[:B, :C], probs[:B, :C]


def init_discriminator_params(key, input_size, hidden_size, num_labels, dtype=jnp.float32):
    """Deterministic init mimicking torch nn.Linear (uniform +/-1/sqrt(fan_in)).
    Weights are stored transposed: [in_features, out_features]."""
    k1, k2, k3, k4 = jax.random.split(key, 4)
    bound1 = 1.0 / jnp.sqrt(jnp.asarray(input_size, jnp.float32))
    bound2 = 1.0 / jnp.sqrt(jnp.asarray(hidden_size, jnp.float32))
    w1 = jax.random.uniform(k1, (input_size, hidden_size), dtype, -bound1, bound1)
    b1 = jax.random.uniform(k2, (1, hidden_size), dtype, -bound1, bound1)
    w2 = jax.random.uniform(k3, (hidden_size, num_labels + 1), dtype, -bound2, bound2)
    b2 = jax.random.uniform(k4, (1, num_labels + 1), dtype, -bound2, bound2)
    return w1, b1, w2, b2


def reference_forward(x, w1, b1, w2, b2):
    h = x @ w1 + b1
    h = jnp.where(h > 0, h, 0.2 * h)
    z = h @ w2 + b2
    p = jax.nn.softmax(z, axis=-1)
    return h, z, p


if __name__ == "__main__":
    # Small shapes consistent with the module (input_size=hidden=128, num_labels=2).
    B, D, H, NUM_LABELS = 256, 128, 128, 2

    key = jax.random.PRNGKey(0)
    kx, kp = jax.random.split(key)
    x = jax.random.normal(kx, (B, D), jnp.float32)
    w1, b1, w2, b2 = init_discriminator_params(kp, D, H, NUM_LABELS)

    # f32 path.
    last_rep, logits, probs = discriminator_forward(x, w1, b1, w2, b2)
    jax.block_until_ready((last_rep, logits, probs))

    ref_last, ref_logits, ref_probs = reference_forward(x, w1, b1, w2, b2)
    assert last_rep.shape == (B, H)
    assert logits.shape == (B, NUM_LABELS + 1) and probs.shape == (B, NUM_LABELS + 1)
    assert jnp.allclose(last_rep, ref_last, atol=1e-4, rtol=1e-4)
    assert jnp.allclose(logits, ref_logits, atol=1e-4, rtol=1e-4)
    assert jnp.allclose(probs, ref_probs, atol=2e-3, rtol=2e-3)

    # bf16 matmul-operand fast path (v6e/v7x) — f32 accumulation, looser check.
    last_bf, logits_bf, probs_bf = discriminator_forward(
        x, w1, b1, w2, b2, matmul_dtype=jnp.bfloat16)
    jax.block_until_ready((last_bf, logits_bf, probs_bf))
    assert jnp.allclose(last_bf, ref_last, atol=5e-2, rtol=5e-2)
    assert jnp.allclose(logits_bf, ref_logits, atol=5e-2, rtol=5e-2)
    assert jnp.allclose(probs_bf, ref_probs, atol=2e-2, rtol=2e-2)

    print("KERNEL_OK")
</pallas_src>

<mosaic_0001>
module attributes {stable_mosaic.version = 11 : i64} {
  func.func @_discriminator_kernel(%arg0: i32, %arg1: memref<128x128xf32, #tpu.memory_space<vmem>>, %arg2: memref<128x128xf32, #tpu.memory_space<vmem>>, %arg3: memref<1x128xf32, #tpu.memory_space<vmem>>, %arg4: memref<128x128xf32, #tpu.memory_space<vmem>>, %arg5: memref<1x128xf32, #tpu.memory_space<vmem>>, %arg6: memref<128x128xf32, #tpu.memory_space<vmem>>, %arg7: memref<128x128xf32, #tpu.memory_space<vmem>>, %arg8: memref<128x128xf32, #tpu.memory_space<vmem>>) attributes {dimension_semantics = [#tpu.dimension_semantics<parallel>], iteration_bounds = array<i64: 2>, scalar_prefetch = 0 : i64, scratch_operands = 0 : i64, tpu.core_type = #tpu.core_type<tc>, window_params = [{transform_indices = @transform_0, window_bounds = array<i64: 128, 128>}, {pipeline_mode = #tpu.pipeline_mode<synchronous>, transform_indices = @transform_1, window_bounds = array<i64: 128, 128>}, {pipeline_mode = #tpu.pipeline_mode<synchronous>, transform_indices = @transform_2, window_bounds = array<i64: 1, 128>}, {pipeline_mode = #tpu.pipeline_mode<synchronous>, transform_indices = @transform_3, window_bounds = array<i64: 128, 128>}, {pipeline_mode = #tpu.pipeline_mode<synchronous>, transform_indices = @transform_4, window_bounds = array<i64: 1, 128>}, {transform_indices = @transform_5, window_bounds = array<i64: 128, 128>}, {transform_indices = @transform_6, window_bounds = array<i64: 128, 128>}, {transform_indices = @transform_7, window_bounds = array<i64: 128, 128>}]} {
    %c0 = arith.constant 0 : index
    %c0_0 = arith.constant 0 : index
    %0 = vector.load %arg1[%c0, %c0_0] : memref<128x128xf32, #tpu.memory_space<vmem>>, vector<128x128xf32>
    %c0_1 = arith.constant 0 : index
    %c0_2 = arith.constant 0 : index
    %1 = vector.load %arg2[%c0_1, %c0_2] : memref<128x128xf32, #tpu.memory_space<vmem>>, vector<128x128xf32>
    %cst = arith.constant dense<0.000000e+00> : vector<128x128xf32>
    %2 = tpu.matmul %0, %1, %cst {dimension_numbers = #tpu.dot_dimension_numbers<[1], [0], [0], [1], [0, 0, 1, 1], [], []>} : vector<128x128xf32>, vector<128x128xf32>, vector<128x128xf32> -> vector<128x128xf32>
    %c0_3 = arith.constant 0 : index
    %c0_4 = arith.constant 0 : index
    %3 = vector.load %arg3[%c0_3, %c0_4] : memref<1x128xf32, #tpu.memory_space<vmem>>, vector<1x128xf32>
    %4 = vector.broadcast %3 : vector<1x128xf32> to vector<128x128xf32>
    %5 = arith.addf %2, %4 : vector<128x128xf32>
    %cst_5 = arith.constant 0.000000e+00 : f32
    %6 = vector.broadcast %cst_5 : f32 to vector<128x128xf32>
    %7 = arith.cmpf ogt, %5, %6 : vector<128x128xf32>
    %cst_6 = arith.constant 2.000000e-01 : f32
    %8 = vector.broadcast %cst_6 : f32 to vector<128x128xf32>
    %9 = arith.mulf %8, %5 : vector<128x128xf32>
    %10 = arith.select %7, %5, %9 : vector<128x128xi1>, vector<128x128xf32>
    %c0_7 = arith.constant 0 : index
    %c0_8 = arith.constant 0 : index
    %11 = vector.load %arg6[%c0_7, %c0_8] : memref<128x128xf32, #tpu.memory_space<vmem>>, vector<128x128xf32>
    tpu.vector_store %arg6[%c0_7, %c0_8], %10 {strides = array<i32>} : memref<128x128xf32, #tpu.memory_space<vmem>>, vector<128x128xf32>,
    %c0_9 = arith.constant 0 : index
    %c0_10 = arith.constant 0 : index
    %12 = vector.load %arg4[%c0_9, %c0_10] : memref<128x128xf32, #tpu.memory_space<vmem>>, vector<128x128xf32>
    %cst_11 = arith.constant dense<0.000000e+00> : vector<128x128xf32>
    %13 = tpu.matmul %10, %12, %cst_11 {dimension_numbers = #tpu.dot_dimension_numbers<[1], [0], [0], [1], [0, 0, 1, 1], [], []>} : vector<128x128xf32>, vector<128x128xf32>, vector<128x128xf32> -> vector<128x128xf32>
    %c0_12 = arith.constant 0 : index
    %c0_13 = arith.constant 0 : index
    %14 = vector.load %arg5[%c0_12, %c0_13] : memref<1x128xf32, #tpu.memory_space<vmem>>, vector<1x128xf32>
    %15 = vector.broadcast %14 : vector<1x128xf32> to vector<128x128xf32>
    %16 = arith.addf %13, %15 : vector<128x128xf32>
    %c0_14 = arith.constant 0 : index
    %c0_15 = arith.constant 0 : index
    %17 = vector.load %arg7[%c0_14, %c0_15] : memref<128x128xf32, #tpu.memory_space<vmem>>, vector<128x128xf32>
    tpu.vector_store %arg7[%c0_14, %c0_15], %16 {strides = array<i32>} : memref<128x128xf32, #tpu.memory_space<vmem>>, vector<128x128xf32>,
    %cst_16 = arith.constant dense<0xFF800000> : vector<128xf32>
    %18 = vector.multi_reduction <maximumf>, %16, %cst_16 [1] : vector<128x128xf32> to vector<128xf32>
    %19 = vector.shape_cast %18 : vector<128xf32> to vector<128x1xf32>
    %20 = vector.broadcast %19 : vector<128x1xf32> to vector<128x128xf32>
    %21 = arith.subf %16, %20 : vector<128x128xf32>
    %22 = math.exp %21 : vector<128x128xf32>
    %cst_17 = arith.constant dense<0.000000e+00> : vector<128xf32>
    %23 = vector.multi_reduction <add>, %22, %cst_17 [1] : vector<128x128xf32> to vector<128xf32>
    %24 = vector.shape_cast %23 : vector<128xf32> to vector<128x1xf32>
    %25 = tpu.reciprocal %24 {approx = true} : vector<128x1xf32> -> vector<128x1xf32>
    %26 = vector.broadcast %25 : vector<128x1xf32> to vector<128x128xf32>
    %27 = arith.mulf %22, %26 : vector<128x128xf32>
    %c0_18 = arith.constant 0 : index
    %c0_19 = arith.constant 0 : index
    %28 = vector.load %arg8[%c0_18, %c0_19] : memref<128x128xf32, #tpu.memory_space<vmem>>, vector<128x128xf32>
    tpu.vector_store %arg8[%c0_18, %c0_19], %27 {strides = array<i32>} : memref<128x128xf32, #tpu.memory_space<vmem>>, vector<128x128xf32>,
    return
  }
  func.func @transform_0(%arg0: i32) -> (i32, i32) {
    %c0_i32 = arith.constant 0 : i32
    %c0_i32_0 = arith.constant 0 : i32
    return %arg0, %c0_i32 : i32, i32
  }
  func.func @transform_1(%arg0: i32) -> (i32, i32) {
    %c0_i32 = arith.constant 0 : i32
    %c0_i32_0 = arith.constant 0 : i32
    %c0_i32_1 = arith.constant 0 : i32
    return %c0_i32, %c0_i32_0 : i32, i32
  }
  func.func @transform_2(%arg0: i32) -> (i32, i32) {
    %c0_i32 = arith.constant 0 : i32
    %c0_i32_0 = arith.constant 0 : i32
    %c0_i32_1 = arith.constant 0 : i32
    return %c0_i32, %c0_i32_0 : i32, i32
  }
  func.func @transform_3(%arg0: i32) -> (i32, i32) {
    %c0_i32 = arith.constant 0 : i32
    %c0_i32_0 = arith.constant 0 : i32
    %c0_i32_1 = arith.constant 0 : i32
    return %c0_i32, %c0_i32_0 : i32, i32
  }
  func.func @transform_4(%arg0: i32) -> (i32, i32) {
    %c0_i32 = arith.constant 0 : i32
    %c0_i32_0 = arith.constant 0 : i32
    %c0_i32_1 = arith.constant 0 : i32
    return %c0_i32, %c0_i32_0 : i32, i32
  }
  func.func @transform_5(%arg0: i32) -> (i32, i32) {
    %c0_i32 = arith.constant 0 : i32
    %c0_i32_0 = arith.constant 0 : i32
    return %arg0, %c0_i32 : i32, i32
  }
  func.func @transform_6(%arg0: i32) -> (i32, i32) {
    %c0_i32 = arith.constant 0 : i32
    %c0_i32_0 = arith.constant 0 : i32
    return %arg0, %c0_i32 : i32, i32
  }
  func.func @transform_7(%arg0: i32) -> (i32, i32) {
    %c0_i32 = arith.constant 0 : i32
    %c0_i32_0 = arith.constant 0 : i32
    return %arg0, %c0_i32 : i32, i32
  }
}

</mosaic_0001>

<bundles_post_ra>
// kernel: discriminator_forward.1
= control target key start
LH: loop header
LB: loop body
LE: loop exit
PB: predicated region body
PF: predicated region fallthrough
CT: control target
= control target key end

     0   :  { %13 = vsyncpa [#allocation3], 0  ;;  %s1595_s0 = inlined_call_operand.vmem [shape: f32[256,128], index: 0, kind: input, shape index: {}]   ;;  %s1596_s1 = inlined_call_operand.vmem [shape: f32[128,128], index: 1, kind: input, shape index: {}]   ;;  %s1597_s2 = inlined_call_operand.vmem [shape: f32[1,128], index: 2, kind: input, shape index: {}]   ;;  %s1598_s3 = inlined_call_operand.vmem [shape: f32[128,128], index: 3, kind: input, shape index: {}]   ;;  %s1599_s4 = inlined_call_operand.vmem [shape: f32[1,128], index: 4, kind: input, shape index: {}]   ;;  %s1600_s5 = inlined_call_operand.hbm [shape: f32[256,128], index: 5, kind: output, shape index: {0}]   ;;  %s1601_s6 = inlined_call_operand.vmem [shape: f32[256,128], index: 6, kind: output, shape index: {1}]   ;;  %s1602_s7 = inlined_call_operand.vmem [shape: f32[256,128], index: 7, kind: output, shape index: {2}]  }
   0x1   :  { %15 = vsyncpa [#allocation3 + $0x1], 0  ;;  %s1141_s24 = smov 0   ;;  %s1143_s25 = smov 0  }
   0x2   :  { %s1145_s26 = smov 0   ;;  %s1147_s27 = smov 0  }
   0x3 LB: > { %s1162_s28 = sadd.s32 4294967295, %s1097_s27   ;;  %s879_s29 = sadd.s32 4294967294, %s1097_s27   ;;  %s1097_s27 = sphi %s1147_s27, %s1608_s27   ;;  %s1093_s26 = sphi %s1145_s26, %s1607_s26   ;;  %s1089_s25 = sphi %s1143_s25, %s1606_s25   ;;  %s1085_s24 = sphi %s1141_s24, %s1605_s24  }
   0x4   : > { %s1166_s30 = sadd.s32 1, %s1097_s27   ;;  %s138_s8 = sadd.s32 1, %s1093_s26 }
   0x5   : > { %s135_s9 = ssub.s32 %s1097_s27, %s1166_s30  ;;  %p148_p0 = scmp.ne.s32.totalorder %s1093_s26, %s1089_s25 }
   0x6   : > { %p136_p1 = scmp.eq.s32.totalorder %s135_s9, 0  ;;  %p149_p2 = scmp.eq.s32.totalorder %s1162_s28, 1 }
   0x7   : > { %p154_p3 = scmp.ne.s32.totalorder %s1089_s25, %s1085_s24  ;;  %p155_p4 = scmp.eq.s32.totalorder %s879_s29, 1 }
   0x8   : > { %s1177_s10 = scalar_select %p136_p1, %s1093_s26, %s138_s8  }
   0x9   : > { %p1179_p5 = por %p149_p2, %p148_p0  ;;  %p1183_p6 = por %p155_p4, %p154_p3 }
   0xa   : > { %p882_p7 = scmp.ge.s32.totalorder %s1097_s27, 1  ;;  %p246_p8 = scmp.lt.s32.totalorder %s1097_s27, 3 }
   0xc   : > { %p247_p9 = pnand %p882_p7, %p246_p8 }
   0xd   : > { %s884_s15 = sshll.u32 (!%p247_p9), %s1162_s28, 4  ;;  %s271_s19 = sand.u32 (!%p247_p9), 1, %s1089_s25  }
   0xe   : > { %250 = sbr.rel (%p247_p9) target bundleno = 632 (0x278), region = 40  ;;  %p289_p10 = scmp.lt.s32.totalorder (!%p247_p9), %s884_s15, 31 }
   0xf   : > { %s895_s14 = sshll.u32 (!%p247_p9), %s1162_s28, 7  ;;  %s734_s22 = scalar_lea.sflag (!%p247_p9), [#allocation3], %s271_s19 }
  0x13   : > { %v338_v0 = vld [vmem:[%s1596_s1 + $0x78] sm:$0xff]  ;;  %v337_v1 = vld [vmem:[%s1596_s1 + $0x70] sm:$0xff]  ;;  %v336_v2 = vld [vmem:[%s1596_s1 + $0x68] sm:$0xff]  ;;  %s1610_s15 = smov (!%p289_p10, %s884_s15), 31 }
  0x14   : > { %343 = vmatpush.msra.mxu0 %v338_v0  ;;  %896 = vmatpush.msra.mxu2 %v338_v0  ;;  %v335_v3 = vld [vmem:[%s1596_s1 + $0x60] sm:$0xff]  ;;  %v334_v4 = vld [vmem:[%s1596_s1 + $0x58] sm:$0xff]  ;;  %v333_v5 = vld [vmem:[%s1596_s1 + $0x50] sm:$0xff]  ;;  %s1229_s9 = sshll.u32 %s1610_s15, 3  ;;  %s883_s15 = sshll.u32 %s271_s19, 7 }
  0x15   : > { %v332_v6 = vld [vmem:[%s1596_s1 + $0x48] sm:$0xff]  ;;  %v331_v7 = vld [vmem:[%s1596_s1 + $0x40] sm:$0xff]  ;;  %v330_v8 = vld [vmem:[%s1596_s1 + $0x38] sm:$0xff]  ;;  %s1241_s20 = scalar_lea.vmem %s1595_s0, %s1229_s9  ;;  %s1319_s21 = scalar_lea.vmem [#allocation2], %s883_s15 }
  0x16   : > { %344 = vmatpush.msra.mxu0 %v337_v1  ;;  %897 = vmatpush.msra.mxu2 %v337_v1  ;;  %v329_v9 = vld [vmem:[%s1596_s1 + $0x30] sm:$0xff]  ;;  %v328_v10 = vld [vmem:[%s1596_s1 + $0x28] sm:$0xff]  ;;  %v327_v11 = vld [vmem:[%s1596_s1 + $0x20] sm:$0xff]  ;;  %s1361_s13 = scalar_lea.vmem %s1601_s6, %s1229_s9  ;;  %s756_s18 = sshll.u32 %s1319_s21, 4  ;;  %s757_s18 = int_to_ptr.vmem [resolvable:$true] %s756_s18 }
  0x17   : > { %v326_v12 = vld [vmem:[%s1596_s1 + $0x18] sm:$0xff]  ;;  %v325_v13 = vld [vmem:[%s1596_s1 + $0x10] sm:$0xff]  ;;  %v324_v14 = vld [vmem:[%s1596_s1 + $0x8] sm:$0xff] }
  0x18   : > { %345 = vmatpush.msra.mxu0 %v336_v2  ;;  %898 = vmatpush.msra.mxu2 %v336_v2  ;;  %v323_v15 = vld [vmem:[%s1596_s1] sm:$0xff]  ;;  %v308_v18 = vld [vmem:[%s1241_s20 + $0x8] sm:$0xff]  ;;  %v309_v20 = vld [vmem:[%s1241_s20 + $0x10] sm:$0xff] }
  0x19   : > { %v307_v16 = vld [vmem:[%s1241_s20] sm:$0xff]  ;;  %v316_v19 = vld [vmem:[%s1241_s20 + $0x48] sm:$0xff]  ;;  %v317_v21 = vld [vmem:[%s1241_s20 + $0x50] sm:$0xff] }
  0x1a   : > { %346 = vmatpush.msra.mxu0 %v335_v3  ;;  %899 = vmatpush.msra.mxu2 %v335_v3  ;;  %v315_v17 = vld [vmem:[%s1241_s20 + $0x40] sm:$0xff]  ;;  %v310_v22 = vld [vmem:[%s1241_s20 + $0x18] sm:$0xff]  ;;  %v486_v25 = vld [vmem:[%s1598_s3 + $0x70] sm:$0xff] }
  0x1b   : > { %v318_v23 = vld [vmem:[%s1241_s20 + $0x58] sm:$0xff]  ;;  %v485_v26 = vld [vmem:[%s1598_s3 + $0x68] sm:$0xff]  ;;  %v484_v27 = vld [vmem:[%s1598_s3 + $0x60] sm:$0xff] }
  0x1c   : > { %347 = vmatpush.msra.mxu0 %v334_v4  ;;  %900 = vmatpush.msra.mxu2 %v334_v4  ;;  %v487_v24 = vld [vmem:[%s1598_s3 + $0x78] sm:$0xff]  ;;  %v311_v28 = vld [vmem:[%s1241_s20 + $0x20] sm:$0xff]  ;;  %v482_v31 = vld [vmem:[%s1598_s3 + $0x50] sm:$0xff] }
  0x1d   : > { %492 = vmatpush.msra.mxu1 %v487_v24  ;;  %912 = vmatpush.msra.mxu3 %v487_v24  ;;  %v319_v29 = vld [vmem:[%s1241_s20 + $0x60] sm:$0xff]  ;;  %v483_v30 = vld [vmem:[%s1598_s3 + $0x58] sm:$0xff]  ;;  %v481_v32 = vld [vmem:[%s1598_s3 + $0x48] sm:$0xff] }
  0x1e   : > { %348 = vmatpush.msra.mxu0 %v333_v5  ;;  %901 = vmatpush.msra.mxu2 %v333_v5  ;;  %v480_v33 = vld [vmem:[%s1598_s3 + $0x40] sm:$0xff]  ;;  %v312_v34 = vld [vmem:[%s1241_s20 + $0x28] sm:$0xff]  ;;  %v479_v36 = vld [vmem:[%s1598_s3 + $0x38] sm:$0xff] }
  0x1f   : > { %493 = vmatpush.msra.mxu1 %v486_v25  ;;  %913 = vmatpush.msra.mxu3 %v486_v25  ;;  %v320_v35 = vld [vmem:[%s1241_s20 + $0x68] sm:$0xff]  ;;  %v478_v37 = vld [vmem:[%s1598_s3 + $0x30] sm:$0xff]  ;;  %v476_v39 = vld [vmem:[%s1598_s3 + $0x20] sm:$0xff] }
  0x20   : > { %349 = vmatpush.msra.mxu0 %v332_v6  ;;  %902 = vmatpush.msra.mxu2 %v332_v6  ;;  %v477_v38 = vld [vmem:[%s1598_s3 + $0x28] sm:$0xff]  ;;  %v313_v40 = vld [vmem:[%s1241_s20 + $0x30] sm:$0xff]  ;;  %v475_v42 = vld [vmem:[%s1598_s3 + $0x18] sm:$0xff] }
  0x21   : > { %494 = vmatpush.msra.mxu1 %v485_v26  ;;  %914 = vmatpush.msra.mxu3 %v485_v26  ;;  %v321_v41 = vld [vmem:[%s1241_s20 + $0x70] sm:$0xff]  ;;  %v314_v43 = vld [vmem:[%s1241_s20 + $0x38] sm:$0xff]  ;;  %v473_v46 = vld [vmem:[%s1598_s3 + $0x8] sm:$0xff] }
  0x22   : > { %350 = vmatpush.msra.mxu0 %v331_v7  ;;  %903 = vmatpush.msra.mxu2 %v331_v7  ;;  %v322_v44 = vld [vmem:[%s1241_s20 + $0x78] sm:$0xff]  ;;  %v474_v45 = vld [vmem:[%s1598_s3 + $0x10] sm:$0xff]  ;;  %v472_v47 = vld [vmem:[%s1598_s3] sm:$0xff]  ;;  %s755_s20 = scalar_lea.hbm %s1600_s5, %s895_s14 }
  0x23   : > { %495 = vmatpush.msra.mxu1 %v484_v27  ;;  %915 = vmatpush.msra.mxu3 %v484_v27  ;;  %v1313_v48 = vld [vmem:[%s1597_s2] ss:$0 sm:$0xff]  ;;  %s758_s15 = sshll.u32 %s755_s20, 4  ;;  %s759_s15 = int_to_ptr.hbm [resolvable:$true] %s758_s15 }
  0x24   : > { %351 = vmatpush.msra.mxu0 %v330_v8  ;;  %904 = vmatpush.msra.mxu2 %v330_v8  ;;  %s1049_s23 = sshra.s32 %s759_s15, 4  ;;  %s1050_s23 = int_to_ptr.hbm [resolvable:$true] %s1049_s23 }
  0x25   : > { %496 = vmatpush.msra.mxu1 %v483_v30  ;;  %916 = vmatpush.msra.mxu3 %v483_v30  ;;  %s1051_s29 = scalar_lea.hbm %s1050_s23, 128  ;;  %p1056_p0 = scmp.lt.s32.totalorder %s1050_s23, %s1600_s5 }
  0x26   : > { %352 = vmatpush.msra.mxu0 %v329_v9  ;;  %905 = vmatpush.msra.mxu2 %v329_v9  ;;  %p1052_p11 = scmp.ne.s32.totalorder %s1050_s23, %s1051_s29 }
  0x27   : > { %497 = vmatpush.msra.mxu1 %v482_v31  ;;  %917 = vmatpush.msra.mxu3 %v482_v31 }
  0x28   : > { %353 = vmatpush.msra.mxu0 %v328_v10  ;;  %906 = vmatpush.msra.mxu2 %v328_v10  ;;  %p1053_p12 = pnand %p1052_p11, %p1179_p5 }
  0x29   : > { %498 = vmatpush.msra.mxu1 %v481_v32  ;;  %918 = vmatpush.msra.mxu3 %v481_v32 }
  0x2a   : > { %354 = vmatpush.msra.mxu0 %v327_v11  ;;  %907 = vmatpush.msra.mxu2 %v327_v11  ;;  %p1054_p13 = pneg %p1053_p12 }
  0x2b   : > { %499 = vmatpush.msra.mxu1 %v480_v33  ;;  %919 = vmatpush.msra.mxu3 %v480_v33 }
  0x2c   : > { %355 = vmatpush.msra.mxu0 %v326_v12  ;;  %908 = vmatpush.msra.mxu2 %v326_v12 }
  0x2d   : > { %500 = vmatpush.msra.mxu1 %v479_v36  ;;  %920 = vmatpush.msra.mxu3 %v479_v36 }
  0x2e   : > { %356 = vmatpush.msra.mxu0 %v325_v13  ;;  %909 = vmatpush.msra.mxu2 %v325_v13 }
  0x2f   : > { %501 = vmatpush.msra.mxu1 %v478_v37  ;;  %921 = vmatpush.msra.mxu3 %v478_v37 }
  0x30   : > { %357 = vmatpush.msra.mxu0 %v324_v14  ;;  %910 = vmatpush.msra.mxu2 %v324_v14 }
  0x31   : > { %502 = vmatpush.msra.mxu1 %v477_v38  ;;  %922 = vmatpush.msra.mxu3 %v477_v38 }
  0x32   : > { %358 = vmatpush.msra.mxu0 %v323_v15  ;;  %911 = vmatpush.msra.mxu2 %v323_v15 }
  0x33   : > { %359 = vmatmul.f32.vlgmr.msra.gmra.mxu0 %v307_v16  ;;  %383 = vmatmul.f32.vlgmr.msra.gmra.mxu2 %v315_v17 }
  0x34   : > { %503 = vmatpush.msra.mxu1 %v476_v39  ;;  %923 = vmatpush.msra.mxu3 %v476_v39 }
  0x36   : > { %504 = vmatpush.msra.mxu1 %v475_v42  ;;  %924 = vmatpush.msra.mxu3 %v475_v42 }
  0x38   : > { %505 = vmatpush.msra.mxu1 %v474_v45  ;;  %925 = vmatpush.msra.mxu3 %v474_v45 }
  0x3a   : > { %506 = vmatpush.msra.mxu1 %v473_v46  ;;  %926 = vmatpush.msra.mxu3 %v473_v46 }
  0x3b   : > { %362 = vmatmul.f32.gmra.mxu0 %v308_v18  ;;  %386 = vmatmul.f32.gmra.mxu2 %v316_v19 }
  0x3c   : > { %507 = vmatpush.msra.mxu1 %v472_v47  ;;  %927 = vmatpush.msra.mxu3 %v472_v47 }
  0x43   : > { %365 = vmatmul.f32.gmra.mxu0 %v309_v20  ;;  %389 = vmatmul.f32.gmra.mxu2 %v317_v21 }
  0x4b   : > { %368 = vmatmul.f32.gmra.mxu0 %v310_v22  ;;  %392 = vmatmul.f32.gmra.mxu2 %v318_v23 }
  0x53   : > { %371 = vmatmul.f32.gmra.mxu0 %v311_v28  ;;  %395 = vmatmul.f32.gmra.mxu2 %v319_v29 }
  0x5b   : > { %374 = vmatmul.f32.gmra.mxu0 %v312_v34  ;;  %398 = vmatmul.f32.gmra.mxu2 %v320_v35 }
  0x63   : > { %377 = vmatmul.f32.gmra.mxu0 %v313_v40  ;;  %401 = vmatmul.f32.gmra.mxu2 %v321_v41 }
  0x6b   : > { %380 = vmatmul.f32.gmra.mxu0 %v314_v43  ;;  %404 = vmatmul.f32.gmra.mxu2 %v322_v44 }
  0xb0   : > { %v360_v49 = vpop.f32.mrf.mxu0 }
  0xb1   : > { %v361_v50 = vadd.f32 %v1313_v48, %v360_v49 }
  0xb3   : > { %vm408_vm0 = vcmp.gt.f32.partialorder %v361_v50, 0.0  ;;  %v424_v51 = vmul.f32 0.2, %v361_v50 }
  0xb5   : > { %v440_v52 = vsel %vm408_vm0, %v361_v50, %v424_v51  ;;  %v1355_v50 = vld [vmem:[%s1599_s4] ss:$0 sm:$0xff] }
  0xb6   : > { %v384_v53 = vpop.f32.mrf.mxu2  ;;  %456 = vst [vmem:[%s1319_s21] sm:$0xff] %v440_v52  ;;  %508 = vmatmul.f32.vlgmr.msra.gmra.mxu1 %v440_v52 }
  0xb7   : > { %v385_v54 = vadd.f32 %v1313_v48, %v384_v53 }
  0xb8   : > { %v363_v55 = vpop.f32.mrf.mxu0 }
  0xb9   : > { %v364_v56 = vadd.f32 %v1313_v48, %v363_v55  ;;  %vm416_vm1 = vcmp.gt.f32.partialorder %v385_v54, 0.0  ;;  %v432_v57 = vmul.f32 0.2, %v385_v54 }
  0xbb   : > { %v448_v58 = vsel %vm416_vm1, %v385_v54, %v432_v57  ;;  %vm409_vm2 = vcmp.gt.f32.partialorder %v364_v56, 0.0  ;;  %v425_v59 = vmul.f32 0.2, %v364_v56 }
  0xbc   : > { %464 = vst [vmem:[%s1319_s21 + $0x40] sm:$0xff] %v448_v58  ;;  %532 = vmatmul.f32.vlgmr.msra.gmra.mxu3 %v448_v58 }
  0xbd   : > { %v441_v60 = vsel %vm409_vm2, %v364_v56, %v425_v59 }
  0xbe   : > { %v387_v61 = vpop.f32.mrf.mxu2  ;;  %457 = vst [vmem:[%s1319_s21 + $0x8] sm:$0xff] %v441_v60  ;;  %511 = vmatmul.f32.gmra.mxu1 %v441_v60 }
  0xbf   : > { %v388_v62 = vadd.f32 %v1313_v48, %v387_v61 }
  0xc0   : > { %v366_v63 = vpop.f32.mrf.mxu0 }
  0xc1   : > { %v367_v0 = vadd.f32 %v1313_v48, %v366_v63  ;;  %vm417_vm3 = vcmp.gt.f32.partialorder %v388_v62, 0.0  ;;  %v433_v1 = vmul.f32 0.2, %v388_v62 }
  0xc3   : > { %v449_v2 = vsel %vm417_vm3, %v388_v62, %v433_v1  ;;  %vm410_vm4 = vcmp.gt.f32.partialorder %v367_v0, 0.0  ;;  %v426_v3 = vmul.f32 0.2, %v367_v0 }
  0xc4   : > { %465 = vst [vmem:[%s1319_s21 + $0x48] sm:$0xff] %v449_v2  ;;  %535 = vmatmul.f32.gmra.mxu3 %v449_v2 }
  0xc5   : > { %v442_v4 = vsel %vm410_vm4, %v367_v0, %v426_v3 }
  0xc6   : > { %v390_v5 = vpop.f32.mrf.mxu2  ;;  %458 = vst [vmem:[%s1319_s21 + $0x10] sm:$0xff] %v442_v4  ;;  %514 = vmatmul.f32.gmra.mxu1 %v442_v4 }
  0xc7   : > { %v391_v6 = vadd.f32 %v1313_v48, %v390_v5 }
  0xc8   : > { %v369_v7 = vpop.f32.mrf.mxu0 }
  0xc9   : > { %v370_v8 = vadd.f32 %v1313_v48, %v369_v7  ;;  %vm418_vm5 = vcmp.gt.f32.partialorder %v391_v6, 0.0  ;;  %v434_v9 = vmul.f32 0.2, %v391_v6 }
  0xcb   : > { %v450_v10 = vsel %vm418_vm5, %v391_v6, %v434_v9  ;;  %vm411_vm6 = vcmp.gt.f32.partialorder %v370_v8, 0.0  ;;  %v427_v11 = vmul.f32 0.2, %v370_v8 }
  0xcc   : > { %466 = vst [vmem:[%s1319_s21 + $0x50] sm:$0xff] %v450_v10  ;;  %538 = vmatmul.f32.gmra.mxu3 %v450_v10 }
  0xcd   : > { %v443_v12 = vsel %vm411_vm6, %v370_v8, %v427_v11 }
  0xce   : > { %v393_v13 = vpop.f32.mrf.mxu2  ;;  %459 = vst [vmem:[%s1319_s21 + $0x18] sm:$0xff] %v443_v12  ;;  %517 = vmatmul.f32.gmra.mxu1 %v443_v12 }
  0xcf   : > { %v394_v14 = vadd.f32 %v1313_v48, %v393_v13 }
  0xd0   : > { %v372_v15 = vpop.f32.mrf.mxu0 }
  0xd1   : > { %v373_v16 = vadd.f32 %v1313_v48, %v372_v15  ;;  %vm419_vm7 = vcmp.gt.f32.partialorder %v394_v14, 0.0  ;;  %v435_v17 = vmul.f32 0.2, %v394_v14 }
  0xd3   : > { %v451_v18 = vsel %vm419_vm7, %v394_v14, %v435_v17  ;;  %vm412_vm8 = vcmp.gt.f32.partialorder %v373_v16, 0.0  ;;  %v428_v19 = vmul.f32 0.2, %v373_v16 }
  0xd4   : > { %467 = vst [vmem:[%s1319_s21 + $0x58] sm:$0xff] %v451_v18  ;;  %541 = vmatmul.f32.gmra.mxu3 %v451_v18 }
  0xd5   : > { %v444_v20 = vsel %vm412_vm8, %v373_v16, %v428_v19 }
  0xd6   : > { %v396_v21 = vpop.f32.mrf.mxu2  ;;  %460 = vst [vmem:[%s1319_s21 + $0x20] sm:$0xff] %v444_v20  ;;  %520 = vmatmul.f32.gmra.mxu1 %v444_v20 }
  0xd7   : > { %v397_v22 = vadd.f32 %v1313_v48, %v396_v21 }
  0xd8   : > { %v375_v23 = vpop.f32.mrf.mxu0 }
  0xd9   : > { %v376_v24 = vadd.f32 %v1313_v48, %v375_v23  ;;  %vm420_vm9 = vcmp.gt.f32.partialorder %v397_v22, 0.0  ;;  %v436_v25 = vmul.f32 0.2, %v397_v22 }
  0xdb   : > { %v452_v26 = vsel %vm420_vm9, %v397_v22, %v436_v25  ;;  %vm413_vm10 = vcmp.gt.f32.partialorder %v376_v24, 0.0  ;;  %v429_v27 = vmul.f32 0.2, %v376_v24 }
  0xdc   : > { %468 = vst [vmem:[%s1319_s21 + $0x60] sm:$0xff] %v452_v26  ;;  %544 = vmatmul.f32.gmra.mxu3 %v452_v26 }
  0xdd   : > { %v445_v28 = vsel %vm413_vm10, %v376_v24, %v429_v27 }
  0xde   : > { %v399_v29 = vpop.f32.mrf.mxu2  ;;  %461 = vst [vmem:[%s1319_s21 + $0x28] sm:$0xff] %v445_v28  ;;  %523 = vmatmul.f32.gmra.mxu1 %v445_v28 }
  0xdf   : > { %v400_v30 = vadd.f32 %v1313_v48, %v399_v29 }
  0xe0   : > { %v378_v31 = vpop.f32.mrf.mxu0 }
  0xe1   : > { %v379_v32 = vadd.f32 %v1313_v48, %v378_v31  ;;  %vm421_vm11 = vcmp.gt.f32.partialorder %v400_v30, 0.0  ;;  %v437_v33 = vmul.f32 0.2, %v400_v30 }
  0xe3   : > { %v453_v34 = vsel %vm421_vm11, %v400_v30, %v437_v33  ;;  %vm414_vm12 = vcmp.gt.f32.partialorder %v379_v32, 0.0  ;;  %v430_v35 = vmul.f32 0.2, %v379_v32 }
  0xe4   : > { %469 = vst [vmem:[%s1319_s21 + $0x68] sm:$0xff] %v453_v34  ;;  %547 = vmatmul.f32.gmra.mxu3 %v453_v34 }
  0xe5   : > { %v446_v36 = vsel %vm414_vm12, %v379_v32, %v430_v35 }
  0xe6   : > { %v402_v37 = vpop.f32.mrf.mxu2  ;;  %462 = vst [vmem:[%s1319_s21 + $0x30] sm:$0xff] %v446_v36  ;;  %526 = vmatmul.f32.gmra.mxu1 %v446_v36 }
  0xe7   : > { %v403_v38 = vadd.f32 %v1313_v48, %v402_v37 }
  0xe8   : > { %v381_v39 = vpop.f32.mrf.mxu0 }
  0xe9   : > { %v382_v40 = vadd.f32 %v1313_v48, %v381_v39  ;;  %vm422_vm13 = vcmp.gt.f32.partialorder %v403_v38, 0.0  ;;  %v438_v41 = vmul.f32 0.2, %v403_v38 }
  0xeb   : > { %v454_v42 = vsel %vm422_vm13, %v403_v38, %v438_v41  ;;  %vm415_vm14 = vcmp.gt.f32.partialorder %v382_v40, 0.0  ;;  %v431_v43 = vmul.f32 0.2, %v382_v40 }
  0xec   : > { %470 = vst [vmem:[%s1319_s21 + $0x70] sm:$0xff] %v454_v42  ;;  %550 = vmatmul.f32.gmra.mxu3 %v454_v42 }
  0xed   : > { %v447_v44 = vsel %vm415_vm14, %v382_v40, %v431_v43 }
  0xee   : > { %v405_v45 = vpop.f32.mrf.mxu2  ;;  %463 = vst [vmem:[%s1319_s21 + $0x38] sm:$0xff] %v447_v44  ;;  %529 = vmatmul.f32.gmra.mxu1 %v447_v44 }
  0xef   : > { %v406_v46 = vadd.f32 %v1313_v48, %v405_v45 }
  0xf1   : > { %vm423_vm15 = vcmp.gt.f32.partialorder %v406_v46, 0.0  ;;  %v439_v47 = vmul.f32 0.2, %v406_v46 }
  0xf3   : > { %v455_v49 = vsel %vm423_vm15, %v406_v46, %v439_v47 }
  0xf4   : > { %471 = vst [vmem:[%s1319_s21 + $0x78] sm:$0xff] %v455_v49  ;;  %553 = vmatmul.f32.gmra.mxu3 %v455_v49 }
 0x133   : > { %v509_v48 = vpop.f32.mrf.mxu1 }
 0x134   : > { %v1364_v51 = vadd.f32 %v1355_v50, %v509_v48 }
 0x136   : > { %557 = vst [vmem:[%s1361_s13] sm:$0xff] %v1364_v51  ;;  %573 = vmax.xlane.f32.xlu0 %v1364_v51 }
 0x13b   : > { %v512_v52 = vpop.f32.mrf.mxu1 }
 0x13c   : > { %v1370_v53 = vadd.f32 %v1355_v50, %v512_v52 }
 0x13e   : > { %558 = vst [vmem:[%s1361_s13 + $0x8] sm:$0xff] %v1370_v53  ;;  %575 = vmax.xlane.f32.xlu0 %v1370_v53 }
 0x13f   : > { %v533_v54 = vpop.f32.mrf.mxu3 }
 0x140   : > { %v1376_v55 = vadd.f32 %v1355_v50, %v533_v54 }
 0x142   : > { %565 = vst [vmem:[%s1361_s13 + $0x40] sm:$0xff] %v1376_v55  ;;  %589 = vmax.xlane.f32.xlu2 %v1376_v55 }
 0x143   : > { %v515_v56 = vpop.f32.mrf.mxu1 }
 0x144   : > { %v1382_v57 = vadd.f32 %v1355_v50, %v515_v56 }
 0x146   : > { %559 = vst [vmem:[%s1361_s13 + $0x10] sm:$0xff] %v1382_v57  ;;  %577 = vmax.xlane.f32.xlu1 %v1382_v57 }
 0x147   : > { %v536_v58 = vpop.f32.mrf.mxu3 }
 0x148   : > { %v1388_v59 = vadd.f32 %v1355_v50, %v536_v58 }
 0x14a   : > { %566 = vst [vmem:[%s1361_s13 + $0x48] sm:$0xff] %v1388_v59  ;;  %591 = vmax.xlane.f32.xlu0 %v1388_v59 }
 0x14b   : > { %v518_v60 = vpop.f32.mrf.mxu1 }
 0x14c   : > { %v1394_v61 = vadd.f32 %v1355_v50, %v518_v60 }
 0x14e   : > { %560 = vst [vmem:[%s1361_s13 + $0x18] sm:$0xff] %v1394_v61  ;;  %579 = vmax.xlane.f32.xlu1 %v1394_v61 }
 0x14f   : > { %v539_v62 = vpop.f32.mrf.mxu3 }
 0x150   : > { %v1400_v63 = vadd.f32 %v1355_v50, %v539_v62 }
 0x152   : > { %567 = vst [vmem:[%s1361_s13 + $0x50] sm:$0xff] %v1400_v63 }
 0x153   : > { %v521_v0 = vpop.f32.mrf.mxu1 }
 0x154   : > { %v1405_v1 = vadd.f32 %v1355_v50, %v521_v0 }
 0x156   : > { %561 = vst [vmem:[%s1361_s13 + $0x20] sm:$0xff] %v1405_v1  ;;  %581 = vmax.xlane.f32.xlu2 %v1405_v1  ;;  %593 = vmax.xlane.f32.xlu1 %v1400_v63 }
 0x157   : > { %v542_v2 = vpop.f32.mrf.mxu3 }
 0x158   : > { %v1412_v3 = vadd.f32 %v1355_v50, %v542_v2 }
 0x15a   : > { %568 = vst [vmem:[%s1361_s13 + $0x58] sm:$0xff] %v1412_v3 }
 0x15b   : > { %v524_v4 = vpop.f32.mrf.mxu1 }
 0x15c   : > { %v1417_v5 = vadd.f32 %v1355_v50, %v524_v4 }
 0x15e   : > { %562 = vst [vmem:[%s1361_s13 + $0x28] sm:$0xff] %v1417_v5  ;;  %595 = vmax.xlane.f32.xlu2 %v1412_v3 }
 0x15f   : > { %v545_v6 = vpop.f32.mrf.mxu3 }
 0x160   : > { %v1423_v7 = vadd.f32 %v1355_v50, %v545_v6 }
 0x162   : > { %569 = vst [vmem:[%s1361_s13 + $0x60] sm:$0xff] %v1423_v7  ;;  %597 = vmax.xlane.f32.xlu0 %v1423_v7 }
 0x163   : > { %v527_v8 = vpop.f32.mrf.mxu1 }
 0x164   : > { %v1429_v9 = vadd.f32 %v1355_v50, %v527_v8 }
 0x166   : > { %563 = vst [vmem:[%s1361_s13 + $0x30] sm:$0xff] %v1429_v9  ;;  %583 = vmax.xlane.f32.xlu2 %v1417_v5 }
 0x167   : > { %v548_v10 = vpop.f32.mrf.mxu3 }
 0x168   : > { %v1435_v11 = vadd.f32 %v1355_v50, %v548_v10 }
 0x16a   : > { %570 = vst [vmem:[%s1361_s13 + $0x68] sm:$0xff] %v1435_v11  ;;  %585 = vmax.xlane.f32.xlu0 %v1429_v9 }
 0x16b   : > { %v530_v12 = vpop.f32.mrf.mxu1 }
 0x16c   : > { %v1441_v13 = vadd.f32 %v1355_v50, %v530_v12 }
 0x16e   : > { %564 = vst [vmem:[%s1361_s13 + $0x38] sm:$0xff] %v1441_v13  ;;  %587 = vmax.xlane.f32.xlu1 %v1441_v13 }
 0x16f   : > { %v551_v14 = vpop.f32.mrf.mxu3 }
 0x170   : > { %v1447_v15 = vadd.f32 %v1355_v50, %v551_v14 }
 0x172   : > { %571 = vst [vmem:[%s1361_s13 + $0x70] sm:$0xff] %v1447_v15  ;;  %601 = vmax.xlane.f32.xlu2 %v1447_v15 }
 0x176   : > { %599 = vmax.xlane.f32.xlu1 %v1435_v11 }
 0x177   : > { %v554_v16 = vpop.f32.mrf.mxu3 }
 0x178   : > { %v1454_v17 = vadd.f32 %v1355_v50, %v554_v16 }
 0x17a   : > { %572 = vst [vmem:[%s1361_s13 + $0x78] sm:$0xff] %v1454_v17  ;;  %603 = vmax.xlane.f32.xlu0 %v1454_v17  ;;  %s1055_s13 = scalar_lea.hbm %s1600_s5, 256 }
 0x17b   : > { %p1057_p1 = scmp.lt.s32.totalorder %s1055_s13, %s1051_s29 }
 0x17d   : > { %p1058_p2 = por %p1057_p1, %p1056_p0 }
 0x17f   : > { %p1059_p3 = pnand %p1058_p2, %p1054_p13 }
 0x1a9   : > { %v574_v18 = vpop.xlane.xlu0 %573 }
 0x1aa   : > { %v605_v19 = vsub.f32 %v1364_v51, %v574_v18 }
 0x1ac   : > { %v621_v20 = vmul.f32 1.442695, %v605_v19 }
 0x1ae   : > { %971 = vpow2.f32 %v621_v20 }
 0x1b1   : > { %v576_v21 = vpop.xlane.xlu0 %575 }
 0x1b2   : > { %v606_v22 = vsub.f32 %v1370_v53, %v576_v21 }
 0x1b4   : > { %v1461_v23 = vpop.eup %971  ;;  %v623_v24 = vmul.f32 1.442695, %v606_v22 }
 0x1b5   : > { %v590_v25 = vpop.xlane.xlu2 %589  ;;  %653 = vadd.xlane.f32.xlu1 %v1461_v23 }
 0x1b6   : > { %973 = vpow2.f32 %v623_v24  ;;  %v613_v26 = vsub.f32 %v1376_v55, %v590_v25 }
 0x1b8   : > { %v637_v27 = vmul.f32 1.442695, %v613_v26 }
 0x1b9   : > { %v578_v28 = vpop.xlane.xlu1 %577 }
 0x1ba   : > { %975 = vpow2.f32 %v637_v27  ;;  %v607_v29 = vsub.f32 %v1382_v57, %v578_v28 }
 0x1bc   : > { %v1466_v30 = vpop.eup %973  ;;  %v625_v31 = vmul.f32 1.442695, %v607_v29 }
 0x1bd   : > { %655 = vadd.xlane.f32.xlu2 %v1466_v30  ;;  %v592_v32 = vpop.xlane.xlu0 %591 }
 0x1be   : > { %v614_v33 = vsub.f32 %v1388_v59, %v592_v32  ;;  %977 = vpow2.f32 %v625_v31 }
 0x1c0   : > { %v1470_v34 = vpop.eup %975  ;;  %v639_v35 = vmul.f32 1.442695, %v614_v33 }
 0x1c1   : > { %v580_v36 = vpop.xlane.xlu1 %579  ;;  %669 = vadd.xlane.f32.xlu0 %v1470_v34 }
 0x1c2   : > { %979 = vpow2.f32 %v639_v35  ;;  %v608_v37 = vsub.f32 %v1394_v61, %v580_v36 }
 0x1c4   : > { %v627_v38 = vmul.f32 1.442695, %v608_v37  ;;  %v1474_v39 = vpop.eup %977 }
 0x1c6   : > { %981 = vpow2.f32 %v627_v38 }
 0x1c8   : > { %v1476_v40 = vpop.eup %979 }
 0x1c9   : > { %v582_v41 = vpop.xlane.xlu2 %581  ;;  %v594_v42 = vpop.xlane.xlu1 %593  ;;  %657 = vadd.xlane.f32.xlu0 %v1474_v39  ;;  %671 = vadd.xlane.f32.xlu1 %v1476_v40 }
 0x1ca   : > { %v615_v43 = vsub.f32 %v1400_v63, %v594_v42  ;;  %v609_v45 = vsub.f32 %v1405_v1, %v582_v41 }
 0x1cc   : > { %v641_v44 = vmul.f32 1.442695, %v615_v43  ;;  %v1482_v46 = vpop.eup %981  ;;  %v629_v50 = vmul.f32 1.442695, %v609_v45 }
 0x1ce   : > { %983 = vpow2.f32 %v641_v44 }
 0x1d1   : > { %v596_v47 = vpop.xlane.xlu2 %595  ;;  %659 = vadd.xlane.f32.xlu1 %v1482_v46 }
 0x1d2   : > { %v616_v49 = vsub.f32 %v1412_v3, %v596_v47 }
 0x1d4   : > { %v643_v48 = vmul.f32 1.442695, %v616_v49  ;;  %v1486_v51 = vpop.eup %983 }
 0x1d5   : > { %v598_v52 = vpop.xlane.xlu0 %597  ;;  %673 = vadd.xlane.f32.xlu2 %v1486_v51 }
 0x1d6   : > { %985 = vpow2.f32 %v643_v48  ;;  %v617_v53 = vsub.f32 %v1423_v7, %v598_v52 }
 0x1d7   : > { %987 = vpow2.f32 %v629_v50 }
 0x1d8   : > { %v645_v54 = vmul.f32 1.442695, %v617_v53 }
 0x1d9   : > { %v584_v55 = vpop.xlane.xlu2 %583 }
 0x1da   : > { %989 = vpow2.f32 %v645_v54  ;;  %v610_v56 = vsub.f32 %v1417_v5, %v584_v55 }
 0x1dc   : > { %v1491_v57 = vpop.eup %985  ;;  %v631_v58 = vmul.f32 1.442695, %v610_v56 }
 0x1dd   : > { %v1493_v59 = vpop.eup %987  ;;  %675 = vadd.xlane.f32.xlu0 %v1491_v57  ;;  %v586_v60 = vpop.xlane.xlu0 %585 }
 0x1de   : > { %991 = vpow2.f32 %v631_v58  ;;  %661 = vadd.xlane.f32.xlu2 %v1493_v59  ;;  %v611_v61 = vsub.f32 %v1429_v9, %v586_v60 }
 0x1e0   : > { %v1498_v62 = vpop.eup %989  ;;  %v633_v63 = vmul.f32 1.442695, %v611_v61 }
 0x1e1   : > { %v588_v0 = vpop.xlane.xlu1 %587  ;;  %677 = vadd.xlane.f32.xlu1 %v1498_v62 }
 0x1e2   : > { %993 = vpow2.f32 %v633_v63  ;;  %v612_v1 = vsub.f32 %v1441_v13, %v588_v0 }
 0x1e4   : > { %v1502_v2 = vpop.eup %991  ;;  %v635_v3 = vmul.f32 1.442695, %v612_v1 }
 0x1e5   : > { %v602_v4 = vpop.xlane.xlu2 %601  ;;  %663 = vadd.xlane.f32.xlu0 %v1502_v2 }
 0x1e6   : > { %995 = vpow2.f32 %v635_v3  ;;  %v619_v5 = vsub.f32 %v1447_v15, %v602_v4 }
 0x1e8   : > { %v1506_v6 = vpop.eup %993  ;;  %v649_v7 = vmul.f32 1.442695, %v619_v5 }
 0x1e9   : > { %v600_v8 = vpop.xlane.xlu1 %599  ;;  %665 = vadd.xlane.f32.xlu1 %v1506_v6 }
 0x1ea   : > { %997 = vpow2.f32 %v649_v7  ;;  %v618_v9 = vsub.f32 %v1435_v11, %v600_v8 }
 0x1ec   : > { %v1510_v10 = vpop.eup %995  ;;  %v647_v12 = vmul.f32 1.442695, %v618_v9 }
 0x1ed   : > { %667 = vadd.xlane.f32.xlu2 %v1510_v10  ;;  %v604_v13 = vpop.xlane.xlu0 %603 }
 0x1ee   : > { %999 = vpow2.f32 %v647_v12  ;;  %v620_v14 = vsub.f32 %v1454_v17, %v604_v13 }
 0x1f0   : > { %v1514_v15 = vpop.eup %997  ;;  %v651_v16 = vmul.f32 1.442695, %v620_v14 }
 0x1f1   : > { %681 = vadd.xlane.f32.xlu0 %v1514_v15 }
 0x1f2   : > { %1001 = vpow2.f32 %v651_v16 }
 0x1f4   : > { %v1518_v18 = vpop.eup %999 }
 0x1f5   : > { %679 = vadd.xlane.f32.xlu2 %v1518_v18 }
 0x1f8   : > { %v1525_v11 = vpop.eup %1001 }
 0x1f9   : > { %1062 = shalt.err (!%p1059_p3)
}
 0x1fa   : > { %s1099_s19 = smov 128   ;;  %s1100_s16 = smov 8   ;;  %683 = vadd.xlane.f32.xlu1 %v1525_v11 }
 0x1fb   : > { %928 = dma.vmem_to_hbm [thread:$0]  (%p1179_p5), %s757_s18, 2048, %s759_s15, %s734_s22, %s1099_s19, %s1099_s19, %s1100_s16  }
 0x1fc   : > { %s1544_s28 = scalar_lea.vmem %s1602_s7, %s1229_s9 }
 0x228   : > { %v654_v17 = vpop.xlane.xlu1 %653 }
 0x229   : > { %1003 = vrcp.f32 %v654_v17 }
 0x22f   : > { %v1004_v19 = vpop.eup %1003 }
 0x230   : > { %v701_v20 = vmul.f32 %v1004_v19, %v1461_v23  ;;  %v656_v21 = vpop.xlane.xlu2 %655 }
 0x231   : > { %1005 = vrcp.f32 %v656_v21 }
 0x232   : > { %717 = vst [vmem:[%s1544_s28] sm:$0xff] %v701_v20 }
 0x234   : > { %v670_v22 = vpop.xlane.xlu0 %669 }
 0x235   : > { %1007 = vrcp.f32 %v670_v22 }
 0x237   : > { %v1006_v24 = vpop.eup %1005 }
 0x238   : > { %v702_v25 = vmul.f32 %v1006_v24, %v1466_v30 }
 0x23a   : > { %718 = vst [vmem:[%s1544_s28 + $0x8] sm:$0xff] %v702_v25 }
 0x23b   : > { %v1008_v26 = vpop.eup %1007 }
 0x23c   : > { %v709_v27 = vmul.f32 %v1008_v26, %v1470_v34  ;;  %v672_v28 = vpop.xlane.xlu1 %671  ;;  %v658_v29 = vpop.xlane.xlu0 %657 }
 0x23d   : > { %1009 = vrcp.f32 %v672_v28 }
 0x23e   : > { %725 = vst [vmem:[%s1544_s28 + $0x40] sm:$0xff] %v709_v27  ;;  %1011 = vrcp.f32 %v658_v29 }
 0x243   : > { %v1010_v23 = vpop.eup %1009 }
 0x244   : > { %v1012_v31 = vpop.eup %1011  ;;  %v710_v32 = vmul.f32 %v1010_v23, %v1476_v40  ;;  %v660_v33 = vpop.xlane.xlu1 %659 }
 0x245   : > { %v703_v35 = vmul.f32 %v1012_v31, %v1474_v39  ;;  %1013 = vrcp.f32 %v660_v33 }
 0x246   : > { %726 = vst [vmem:[%s1544_s28 + $0x48] sm:$0xff] %v710_v32 }
 0x247   : > { %719 = vst [vmem:[%s1544_s28 + $0x10] sm:$0xff] %v703_v35 }
 0x248   : > { %v674_v30 = vpop.xlane.xlu2 %673 }
 0x249   : > { %1015 = vrcp.f32 %v674_v30 }
 0x24b   : > { %v1014_v34 = vpop.eup %1013 }
 0x24c   : > { %v704_v36 = vmul.f32 %v1014_v34, %v1482_v46 }
 0x24e   : > { %720 = vst [vmem:[%s1544_s28 + $0x18] sm:$0xff] %v704_v36 }
 0x24f   : > { %v1016_v37 = vpop.eup %1015 }
 0x250   : > { %v676_v38 = vpop.xlane.xlu0 %675  ;;  %v711_v41 = vmul.f32 %v1016_v37, %v1486_v51 }
 0x251   : > { %v662_v40 = vpop.xlane.xlu2 %661  ;;  %1017 = vrcp.f32 %v676_v38 }
 0x252   : > { %1019 = vrcp.f32 %v662_v40  ;;  %727 = vst [vmem:[%s1544_s28 + $0x50] sm:$0xff] %v711_v41 }
 0x254   : > { %v678_v39 = vpop.xlane.xlu1 %677 }
 0x255   : > { %1021 = vrcp.f32 %v678_v39 }
 0x257   : > { %v1018_v42 = vpop.eup %1017 }
 0x258   : > { %v1020_v43 = vpop.eup %1019  ;;  %v712_v44 = vmul.f32 %v1018_v42, %v1491_v57  ;;  %v664_v45 = vpop.xlane.xlu0 %663 }
 0x259   : > { %v705_v46 = vmul.f32 %v1020_v43, %v1493_v59  ;;  %1023 = vrcp.f32 %v664_v45 }
 0x25a   : > { %728 = vst [vmem:[%s1544_s28 + $0x58] sm:$0xff] %v712_v44 }
 0x25b   : > { %v1022_v47 = vpop.eup %1021  ;;  %721 = vst [vmem:[%s1544_s28 + $0x20] sm:$0xff] %v705_v46 }
 0x25c   : > { %v713_v49 = vmul.f32 %v1022_v47, %v1498_v62  ;;  %v666_v50 = vpop.xlane.xlu1 %665 }
 0x25d   : > { %1025 = vrcp.f32 %v666_v50 }
 0x25e   : > { %729 = vst [vmem:[%s1544_s28 + $0x60] sm:$0xff] %v713_v49 }
 0x25f   : > { %v1024_v48 = vpop.eup %1023 }
 0x260   : > { %v706_v51 = vmul.f32 %v1024_v48, %v1502_v2  ;;  %v668_v52 = vpop.xlane.xlu2 %667 }
 0x261   : > { %1027 = vrcp.f32 %v668_v52 }
 0x262   : > { %722 = vst [vmem:[%s1544_s28 + $0x28] sm:$0xff] %v706_v51 }
 0x263   : > { %v1026_v53 = vpop.eup %1025 }
 0x264   : > { %v707_v54 = vmul.f32 %v1026_v53, %v1506_v6  ;;  %v682_v55 = vpop.xlane.xlu0 %681 }
 0x265   : > { %1029 = vrcp.f32 %v682_v55 }
 0x266   : > { %723 = vst [vmem:[%s1544_s28 + $0x30] sm:$0xff] %v707_v54 }
 0x267   : > { %v1028_v56 = vpop.eup %1027 }
 0x268   : > { %v708_v57 = vmul.f32 %v1028_v56, %v1510_v10  ;;  %v680_v58 = vpop.xlane.xlu2 %679 }
 0x269   : > { %1031 = vrcp.f32 %v680_v58 }
 0x26a   : > { %724 = vst [vmem:[%s1544_s28 + $0x38] sm:$0xff] %v708_v57 }
 0x26b   : > { %v1030_v59 = vpop.eup %1029 }
 0x26c   : > { %v715_v60 = vmul.f32 %v1030_v59, %v1514_v15 }
 0x26d   : > { %v684_v61 = vpop.xlane.xlu1 %683 }
 0x26e   : > { %1033 = vrcp.f32 %v684_v61  ;;  %731 = vst [vmem:[%s1544_s28 + $0x70] sm:$0xff] %v715_v60 }
 0x26f   : > { %v1032_v62 = vpop.eup %1031 }
 0x270   : > { %v714_v63 = vmul.f32 %v1032_v62, %v1518_v18 }
 0x272   : > { %730 = vst [vmem:[%s1544_s28 + $0x68] sm:$0xff] %v714_v63 }
 0x274   : > { %v1034_v0 = vpop.eup %1033 }
 0x275   : > { %v716_v1 = vmul.f32 %v1034_v0, %v1525_v11 }
 0x277   : > { %732 = vst [vmem:[%s1544_s28 + $0x78] sm:$0xff] %v716_v1 }
 0x278 PF: > { %p934_p4 = scmp.ge.s32.totalorder %s1097_s27, 2  ;;  %s781_s11 = sand.u32 1, %s1085_s24  }
 0x279   : > { %s782_s9 = scalar_lea.sflag [#allocation3], %s781_s11 }
 0x27a   : > { %p931_p5 = pnand %p934_p4, %p1183_p6 }
 0x27c   : > { %p932_p7 = pneg %p931_p5 }
 0x27e   : > { %1080 = dma.done.wait (%p932_p7), %s782_s9, 2048  }
 0x27f   : > { %1082 = vsyncadd (%p932_p7), %s782_s9, 4294965248  ;;  %p18_p8 = scmp.ge.s32.totalorder %s1166_s30, 4   ;;  %s1605_s24 = smov %s1089_s25 }
 0x280   : > { %s1606_s25 = smov %s1093_s26  ;;  %s1607_s26 = smov %s1177_s10 }
 0x281   : > { %s1608_s27 = smov %s1166_s30  ;;  %20 = sbr.rel (!%p18_p8) target bundleno = 3 (0x3), region = 99 }
 0x286   :  { %804 = vsyncpa [#allocation3], 1 }
 0x287   :  { %806 = vsyncpa [#allocation3 + $0x1], 1 }

</bundles_post_ra>
